<compile_context>
chip_gen: v7x
topology: tpu7x:2x2x1
jax: 0.10.0
libtpu: 0.0.40
codegen_flags: <defaults>
</compile_context>

<pallas_src>
import jax
import jax.numpy as jnp
from jax.experimental import pallas as pl
from jax.experimental.pallas import tpu as pltpu

_LANE = 128


def _make_spectral_mul_kernel(B, Ci, Co):
    """Kernel over refs:
         xs_ref : (2, B*Ci,  TM)   [real, imag] retained FFT modes, row = b*Ci + i
         ws_ref : (2, Ci*Co, TM)   [real, imag] spectral weights,   row = i*Co + o
         os_ref : (2, B*Co,  TM)   [real, imag] output modes,       row = b*Co + o
    """

    def kernel(xs_ref, ws_ref, os_ref):
        tm = xs_ref.shape[-1]
        f32 = jnp.float32

        for b in range(B):                                   # B is small & static in FNO
            acc_r = jnp.zeros((Co, tm), f32)
            acc_i = jnp.zeros((Co, tm), f32)

            def ci_step(i, acc, b=b):
                acc_r, acc_i = acc
                # Per-(b, i) slabs loaded straight from the refs (keeps the live set tiny,
                # no up-front (Ci, Co, TM) materialization -> no spills at big Ci/Co).
                xrow = b * Ci + i
                wrow = i * Co
                if not isinstance(i, int):                   # dynamic (fori_loop) index
                    wrow = pl.multiple_of(wrow, Co)
                xr = xs_ref[0, pl.ds(xrow, 1), :].astype(f32)      # (1,  TM)
                xi = xs_ref[1, pl.ds(xrow, 1), :].astype(f32)      # (1,  TM)
                wr = ws_ref[0, pl.ds(wrow, Co), :].astype(f32)     # (Co, TM)
                wi = ws_ref[1, pl.ds(wrow, Co), :].astype(f32)     # (Co, TM)
                # (a + jb)(c + jd) = (ac - bd) + j(ad + bc); x broadcasts over Co sublanes.
                return (acc_r + xr * wr - xi * wi,
                        acc_i + xr * wi + xi * wr)

            if Ci <= 8:
                # Small static Ci: full unroll (ref loads per i keep live ranges bounded).
                for i in range(Ci):
                    acc_r, acc_i = ci_step(i, (acc_r, acc_i))
            else:
                # Production widths: visible loop bounds vreg pressure; modest unroll keeps
                # the LLO scheduler fed.
                acc_r, acc_i = jax.lax.fori_loop(0, Ci, ci_step, (acc_r, acc_i), unroll=4)

            os_ref[0, pl.ds(b * Co, Co), :] = acc_r
            os_ref[1, pl.ds(b * Co, Co), :] = acc_i

    return kernel


def _pick_mode_tile(M_pad, rows_x, rows_w, rows_o, in_itemsize):
    """VMEM-budget-aware tile size over the mode axis and a matching vmem limit."""
    try:
        vmem_cap = pltpu.get_tpu_info().vmem_capacity_bytes   # 64 MiB v7x, 128 MiB v5e/v6e
    except Exception:
        vmem_cap = 64 << 20                                    # v7x-safe fallback
    # Bytes of VMEM per lane of tile width: re/im factor 2, double-buffered factor 2.
    one_buf_per_lane = 2 * (rows_x * in_itemsize + rows_w * in_itemsize + rows_o * 4)
    bytes_per_lane = 2 * one_buf_per_lane
    budget = vmem_cap // 2                                     # headroom for scratch/regalloc
    tm = max(_LANE, (budget // bytes_per_lane) // _LANE * _LANE)
    tm = min(tm, M_pad)
    while M_pad % tm:                                          # make tm divide M_pad
        tm -= _LANE
    # Give v7x's two TensorCores at least one "parallel" step each whenever M allows it
    # (costs one extra ~0.35us step on single-TC v5e/v6e, wins up to 2x on v7x).
    if M_pad // tm < 2 and M_pad >= 2 * _LANE:
        tm = max(_LANE, (M_pad // 2) // _LANE * _LANE)
        while M_pad % tm:
            tm -= _LANE
    tile_bytes = bytes_per_lane * tm
    vmem_limit = int(min(vmem_cap, max(32 << 20, tile_bytes + (4 << 20))))
    return tm, vmem_limit


def _spectral_mul_pallas(xs, ws, B, Ci, Co):
    """xs: (2, B*Ci, M_pad), ws: (2, Ci*Co, M_pad) -> (2, B*Co, M_pad) float32."""
    _, rows_x, M_pad = xs.shape
    rows_w = ws.shape[1]
    rows_o = B * Co

    tm, vmem_limit = _pick_mode_tile(M_pad, rows_x, rows_w, rows_o, xs.dtype.itemsize)

    cost = pl.CostEstimate(
        flops=8 * M_pad * B * Ci * Co,            # 4 mul + 4 add per (b, o, i, m)
        transcendentals=0,
        bytes_accessed=(xs.size * xs.dtype.itemsize
                        + ws.size * ws.dtype.itemsize
                        + 2 * rows_o * M_pad * 4),
    )

    return pl.pallas_call(
        _make_spectral_mul_kernel(B, Ci, Co),
        out_shape=jax.ShapeDtypeStruct((2, rows_o, M_pad), jnp.float32),
        grid=(M_pad // tm,),
        in_specs=[
            pl.BlockSpec((2, rows_x, tm), lambda m: (0, 0, m)),
            pl.BlockSpec((2, rows_w, tm), lambda m: (0, 0, m)),
        ],
        out_specs=pl.BlockSpec((2, rows_o, tm), lambda m: (0, 0, m)),
        compiler_params=pltpu.CompilerParams(
            dimension_semantics=("parallel",),
            vmem_limit_bytes=vmem_limit,
        ),
        cost_estimate=cost,
    )(xs, ws)


def spectral_conv2d(x, weights1, weights2, modes1, modes2, compute_dtype=jnp.float32):
    """Forward pass of SpectralConv2d.

    x        : (B, Cin, H, W) float32   (NCHW, same as the PyTorch module)
    weights1 : (Cin, Cout, modes1, modes2) complex64
    weights2 : (Cin, Cout, modes1, modes2) complex64
    compute_dtype: jnp.float32 (default). On v6e/v7x, jnp.bfloat16 halves HBM/VMEM/DMA
                   traffic for the mode tensors (f32 accumulation in-kernel) at a precision
                   cost; keep f32 on v5e (no bf16 VALU) unless profiling shows HBM-bound.
    returns  : (B, Cout, H, W) float32
    """
    B, Ci, H, W = x.shape
    Co = weights1.shape[1]
    Wf = W // 2 + 1
    M = 2 * modes1 * modes2
    M_pad = ((M + _LANE - 1) // _LANE) * _LANE

    # TODO(synk): FFT / inverse FFT have no Pallas equivalent; kept in plain JAX/XLA.
    x_ft = jnp.fft.rfft2(x, axes=(-2, -1))                     # (B, Ci, H, Wf) complex64

    # Gather the two retained corner blocks with (B, Ci) leading so a plain reshape makes
    # the mode axis lane-major with folded rows (b*Ci + i) on the sublane axis.
    x_modes = jnp.concatenate(
        [x_ft[:, :, :modes1, :modes2], x_ft[:, :, H - modes1:, :modes2]], axis=2,
    ).reshape(B * Ci, M)                                        # (B*Ci, M) complex64
    w_modes = jnp.concatenate([weights1, weights2], axis=2).reshape(Ci * Co, M)

    # Re/im stacked on a leading size-2 axis (3 DMA streams instead of 6); the zero pad of
    # the mode axis is folded into the same buffer write (no separate stack + pad copies).
    xs = jnp.zeros((2, B * Ci, M_pad), compute_dtype)
    xs = xs.at[0, :, :M].set(jnp.real(x_modes).astype(compute_dtype))
    xs = xs.at[1, :, :M].set(jnp.imag(x_modes).astype(compute_dtype))
    ws = jnp.zeros((2, Ci * Co, M_pad), compute_dtype)
    ws = ws.at[0, :, :M].set(jnp.real(w_modes).astype(compute_dtype))
    ws = ws.at[1, :, :M].set(jnp.imag(w_modes).astype(compute_dtype))

    outs = _spectral_mul_pallas(xs, ws, B, Ci, Co)              # (2, B*Co, M_pad) f32

    # Padded tail modes are zero and sliced off; rebuild complex corners and scatter.
    out_c = jax.lax.complex(outs[0, :, :M], outs[1, :, :M])     # (B*Co, M) complex64
    out_c = out_c.reshape(B, Co, 2 * modes1, modes2)

    out_ft = jnp.zeros((B, Co, H, Wf), dtype=jnp.complex64)
    out_ft = out_ft.at[:, :, :modes1, :modes2].set(out_c[:, :, :modes1, :])
    out_ft = out_ft.at[:, :, H - modes1:, :modes2].set(out_c[:, :, modes1:, :])

    return jnp.fft.irfft2(out_ft, s=(H, W), axes=(-2, -1)).astype(jnp.float32)


def _reference_forward(x, weights1, weights2, modes1, modes2):
    """Pure-JAX reference (mirrors the PyTorch forward exactly)."""
    B, Ci, H, W = x.shape
    Co = weights1.shape[1]
    Wf = W // 2 + 1
    x_ft = jnp.fft.rfft2(x, axes=(-2, -1))
    out_ft = jnp.zeros((B, Co, H, Wf), dtype=jnp.complex64)
    out_ft = out_ft.at[:, :, :modes1, :modes2].set(
        jnp.einsum('bixy,ioxy->boxy', x_ft[:, :, :modes1, :modes2], weights1))
    out_ft = out_ft.at[:, :, H - modes1:, :modes2].set(
        jnp.einsum('bixy,ioxy->boxy', x_ft[:, :, H - modes1:, :modes2], weights2))
    return jnp.fft.irfft2(out_ft, s=(H, W), axes=(-2, -1)).astype(jnp.float32)


if __name__ == "__main__":
    B, Ci, Co = 2, 4, 4
    H = W = 16
    modes1 = modes2 = 4

    key = jax.random.PRNGKey(0)
    kx, kw1r, kw1i, kw2r, kw2i = jax.random.split(key, 5)

    x = jax.random.normal(kx, (B, Ci, H, W), dtype=jnp.float32)

    scale = 1.0 / (Ci * Co)
    # torch.rand(..., dtype=torch.cfloat): uniform [0,1) real and imaginary parts.
    weights1 = scale * (jax.random.uniform(kw1r, (Ci, Co, modes1, modes2))
                        + 1j * jax.random.uniform(kw1i, (Ci, Co, modes1, modes2)))
    weights2 = scale * (jax.random.uniform(kw2r, (Ci, Co, modes1, modes2))
                        + 1j * jax.random.uniform(kw2i, (Ci, Co, modes1, modes2)))
    weights1 = weights1.astype(jnp.complex64)
    weights2 = weights2.astype(jnp.complex64)

    out = spectral_conv2d(x, weights1, weights2, modes1, modes2)
    out = jax.block_until_ready(out)

    ref = jax.block_until_ready(_reference_forward(x, weights1, weights2, modes1, modes2))
    assert out.shape == (B, Co, H, W)
    assert jnp.allclose(out, ref, atol=1e-5, rtol=1e-5), "mismatch vs reference"

    print("KERNEL_OK")
</pallas_src>

<mosaic_0001>
module attributes {stable_mosaic.version = 11 : i64} {
  func.func @kernel(%arg0: i32, %arg1: memref<2x8x128xf32, #tpu.memory_space<vmem>>, %arg2: memref<2x16x128xf32, #tpu.memory_space<vmem>>, %arg3: memref<2x8x128xf32, #tpu.memory_space<vmem>>) attributes {dimension_semantics = [#tpu.dimension_semantics<parallel>], iteration_bounds = array<i64: 1>, scalar_prefetch = 0 : i64, scratch_operands = 0 : i64, tpu.core_type = #tpu.core_type<tc>, window_params = [{transform_indices = @transform_0, window_bounds = array<i64: 2, 8, 128>}, {transform_indices = @transform_1, window_bounds = array<i64: 2, 16, 128>}, {transform_indices = @transform_2, window_bounds = array<i64: 2, 8, 128>}]} {
    %cst = arith.constant 0.000000e+00 : f32
    %0 = vector.broadcast %cst : f32 to vector<4x128xf32>
    %cst_0 = arith.constant 0.000000e+00 : f32
    %1 = vector.broadcast %cst_0 : f32 to vector<4x128xf32>
    %c0 = arith.constant 0 : index
    %c0_1 = arith.constant 0 : index
    %c0_2 = arith.constant 0 : index
    %2 = vector.load %arg1[%c0, %c0_1, %c0_2] : memref<2x8x128xf32, #tpu.memory_space<vmem>>, vector<1x1x128xf32>
    %3 = vector.shape_cast %2 : vector<1x1x128xf32> to vector<1x128xf32>
    %c1 = arith.constant 1 : index
    %c0_3 = arith.constant 0 : index
    %c0_4 = arith.constant 0 : index
    %4 = vector.load %arg1[%c1, %c0_3, %c0_4] : memref<2x8x128xf32, #tpu.memory_space<vmem>>, vector<1x1x128xf32>
    %5 = vector.shape_cast %4 : vector<1x1x128xf32> to vector<1x128xf32>
    %c0_5 = arith.constant 0 : index
    %c0_6 = arith.constant 0 : index
    %c0_7 = arith.constant 0 : index
    %6 = vector.load %arg2[%c0_5, %c0_6, %c0_7] : memref<2x16x128xf32, #tpu.memory_space<vmem>>, vector<1x4x128xf32>
    %7 = vector.shape_cast %6 : vector<1x4x128xf32> to vector<4x128xf32>
    %c1_8 = arith.constant 1 : index
    %c0_9 = arith.constant 0 : index
    %c0_10 = arith.constant 0 : index
    %8 = vector.load %arg2[%c1_8, %c0_9, %c0_10] : memref<2x16x128xf32, #tpu.memory_space<vmem>>, vector<1x4x128xf32>
    %9 = vector.shape_cast %8 : vector<1x4x128xf32> to vector<4x128xf32>
    %10 = vector.broadcast %3 : vector<1x128xf32> to vector<4x128xf32>
    %11 = arith.mulf %10, %7 : vector<4x128xf32>
    %12 = arith.addf %0, %11 : vector<4x128xf32>
    %13 = vector.broadcast %5 : vector<1x128xf32> to vector<4x128xf32>
    %14 = arith.mulf %13, %9 : vector<4x128xf32>
    %15 = arith.subf %12, %14 : vector<4x128xf32>
    %16 = vector.broadcast %3 : vector<1x128xf32> to vector<4x128xf32>
    %17 = arith.mulf %16, %9 : vector<4x128xf32>
    %18 = arith.addf %1, %17 : vector<4x128xf32>
    %19 = vector.broadcast %5 : vector<1x128xf32> to vector<4x128xf32>
    %20 = arith.mulf %19, %7 : vector<4x128xf32>
    %21 = arith.addf %18, %20 : vector<4x128xf32>
    %c0_11 = arith.constant 0 : index
    %c1_12 = arith.constant 1 : index
    %c0_13 = arith.constant 0 : index
    %22 = vector.load %arg1[%c0_11, %c1_12, %c0_13] : memref<2x8x128xf32, #tpu.memory_space<vmem>>, vector<1x1x128xf32>
    %23 = vector.shape_cast %22 : vector<1x1x128xf32> to vector<1x128xf32>
    %c1_14 = arith.constant 1 : index
    %c1_15 = arith.constant 1 : index
    %c0_16 = arith.constant 0 : index
    %24 = vector.load %arg1[%c1_14, %c1_15, %c0_16] : memref<2x8x128xf32, #tpu.memory_space<vmem>>, vector<1x1x128xf32>
    %25 = vector.shape_cast %24 : vector<1x1x128xf32> to vector<1x128xf32>
    %c0_17 = arith.constant 0 : index
    %c4 = arith.constant 4 : index
    %c0_18 = arith.constant 0 : index
    %26 = vector.load %arg2[%c0_17, %c4, %c0_18] : memref<2x16x128xf32, #tpu.memory_space<vmem>>, vector<1x4x128xf32>
    %27 = vector.shape_cast %26 : vector<1x4x128xf32> to vector<4x128xf32>
    %c1_19 = arith.constant 1 : index
    %c4_20 = arith.constant 4 : index
    %c0_21 = arith.constant 0 : index
    %28 = vector.load %arg2[%c1_19, %c4_20, %c0_21] : memref<2x16x128xf32, #tpu.memory_space<vmem>>, vector<1x4x128xf32>
    %29 = vector.shape_cast %28 : vector<1x4x128xf32> to vector<4x128xf32>
    %30 = vector.broadcast %23 : vector<1x128xf32> to vector<4x128xf32>
    %31 = arith.mulf %30, %27 : vector<4x128xf32>
    %32 = arith.addf %15, %31 : vector<4x128xf32>
    %33 = vector.broadcast %25 : vector<1x128xf32> to vector<4x128xf32>
    %34 = arith.mulf %33, %29 : vector<4x128xf32>
    %35 = arith.subf %32, %34 : vector<4x128xf32>
    %36 = vector.broadcast %23 : vector<1x128xf32> to vector<4x128xf32>
    %37 = arith.mulf %36, %29 : vector<4x128xf32>
    %38 = arith.addf %21, %37 : vector<4x128xf32>
    %39 = vector.broadcast %25 : vector<1x128xf32> to vector<4x128xf32>
    %40 = arith.mulf %39, %27 : vector<4x128xf32>
    %41 = arith.addf %38, %40 : vector<4x128xf32>
    %c0_22 = arith.constant 0 : index
    %c2 = arith.constant 2 : index
    %c0_23 = arith.constant 0 : index
    %42 = vector.load %arg1[%c0_22, %c2, %c0_23] : memref<2x8x128xf32, #tpu.memory_space<vmem>>, vector<1x1x128xf32>
    %43 = vector.shape_cast %42 : vector<1x1x128xf32> to vector<1x128xf32>
    %c1_24 = arith.constant 1 : index
    %c2_25 = arith.constant 2 : index
    %c0_26 = arith.constant 0 : index
    %44 = vector.load %arg1[%c1_24, %c2_25, %c0_26] : memref<2x8x128xf32, #tpu.memory_space<vmem>>, vector<1x1x128xf32>
    %45 = vector.shape_cast %44 : vector<1x1x128xf32> to vector<1x128xf32>
    %c0_27 = arith.constant 0 : index
    %c8 = arith.constant 8 : index
    %c0_28 = arith.constant 0 : index
    %46 = vector.load %arg2[%c0_27, %c8, %c0_28] : memref<2x16x128xf32, #tpu.memory_space<vmem>>, vector<1x4x128xf32>
    %47 = vector.shape_cast %46 : vector<1x4x128xf32> to vector<4x128xf32>
    %c1_29 = arith.constant 1 : index
    %c8_30 = arith.constant 8 : index
    %c0_31 = arith.constant 0 : index
    %48 = vector.load %arg2[%c1_29, %c8_30, %c0_31] : memref<2x16x128xf32, #tpu.memory_space<vmem>>, vector<1x4x128xf32>
    %49 = vector.shape_cast %48 : vector<1x4x128xf32> to vector<4x128xf32>
    %50 = vector.broadcast %43 : vector<1x128xf32> to vector<4x128xf32>
    %51 = arith.mulf %50, %47 : vector<4x128xf32>
    %52 = arith.addf %35, %51 : vector<4x128xf32>
    %53 = vector.broadcast %45 : vector<1x128xf32> to vector<4x128xf32>
    %54 = arith.mulf %53, %49 : vector<4x128xf32>
    %55 = arith.subf %52, %54 : vector<4x128xf32>
    %56 = vector.broadcast %43 : vector<1x128xf32> to vector<4x128xf32>
    %57 = arith.mulf %56, %49 : vector<4x128xf32>
    %58 = arith.addf %41, %57 : vector<4x128xf32>
    %59 = vector.broadcast %45 : vector<1x128xf32> to vector<4x128xf32>
    %60 = arith.mulf %59, %47 : vector<4x128xf32>
    %61 = arith.addf %58, %60 : vector<4x128xf32>
    %c0_32 = arith.constant 0 : index
    %c3 = arith.constant 3 : index
    %c0_33 = arith.constant 0 : index
    %62 = vector.load %arg1[%c0_32, %c3, %c0_33] : memref<2x8x128xf32, #tpu.memory_space<vmem>>, vector<1x1x128xf32>
    %63 = vector.shape_cast %62 : vector<1x1x128xf32> to vector<1x128xf32>
    %c1_34 = arith.constant 1 : index
    %c3_35 = arith.constant 3 : index
    %c0_36 = arith.constant 0 : index
    %64 = vector.load %arg1[%c1_34, %c3_35, %c0_36] : memref<2x8x128xf32, #tpu.memory_space<vmem>>, vector<1x1x128xf32>
    %65 = vector.shape_cast %64 : vector<1x1x128xf32> to vector<1x128xf32>
    %c0_37 = arith.constant 0 : index
    %c12 = arith.constant 12 : index
    %c0_38 = arith.constant 0 : index
    %66 = vector.load %arg2[%c0_37, %c12, %c0_38] : memref<2x16x128xf32, #tpu.memory_space<vmem>>, vector<1x4x128xf32>
    %67 = vector.shape_cast %66 : vector<1x4x128xf32> to vector<4x128xf32>
    %c1_39 = arith.constant 1 : index
    %c12_40 = arith.constant 12 : index
    %c0_41 = arith.constant 0 : index
    %68 = vector.load %arg2[%c1_39, %c12_40, %c0_41] : memref<2x16x128xf32, #tpu.memory_space<vmem>>, vector<1x4x128xf32>
    %69 = vector.shape_cast %68 : vector<1x4x128xf32> to vector<4x128xf32>
    %70 = vector.broadcast %63 : vector<1x128xf32> to vector<4x128xf32>
    %71 = arith.mulf %70, %67 : vector<4x128xf32>
    %72 = arith.addf %55, %71 : vector<4x128xf32>
    %73 = vector.broadcast %65 : vector<1x128xf32> to vector<4x128xf32>
    %74 = arith.mulf %73, %69 : vector<4x128xf32>
    %75 = arith.subf %72, %74 : vector<4x128xf32>
    %76 = vector.broadcast %63 : vector<1x128xf32> to vector<4x128xf32>
    %77 = arith.mulf %76, %69 : vector<4x128xf32>
    %78 = arith.addf %61, %77 : vector<4x128xf32>
    %79 = vector.broadcast %65 : vector<1x128xf32> to vector<4x128xf32>
    %80 = arith.mulf %79, %67 : vector<4x128xf32>
    %81 = arith.addf %78, %80 : vector<4x128xf32>
    %c0_42 = arith.constant 0 : index
    %c0_43 = arith.constant 0 : index
    %c0_44 = arith.constant 0 : index
    %82 = vector.load %arg3[%c0_42, %c0_43, %c0_44] : memref<2x8x128xf32, #tpu.memory_space<vmem>>, vector<1x4x128xf32>
    %83 = vector.shape_cast %82 : vector<1x4x128xf32> to vector<4x128xf32>
    %84 = vector.shape_cast %75 : vector<4x128xf32> to vector<1x4x128xf32>
    tpu.vector_store %arg3[%c0_42, %c0_43, %c0_44], %84 {strides = array<i32>} : memref<2x8x128xf32, #tpu.memory_space<vmem>>, vector<1x4x128xf32>,
    %c1_45 = arith.constant 1 : index
    %c0_46 = arith.constant 0 : index
    %c0_47 = arith.constant 0 : index
    %85 = vector.load %arg3[%c1_45, %c0_46, %c0_47] : memref<2x8x128xf32, #tpu.memory_space<vmem>>, vector<1x4x128xf32>
    %86 = vector.shape_cast %85 : vector<1x4x128xf32> to vector<4x128xf32>
    %87 = vector.shape_cast %81 : vector<4x128xf32> to vector<1x4x128xf32>
    tpu.vector_store %arg3[%c1_45, %c0_46, %c0_47], %87 {strides = array<i32>} : memref<2x8x128xf32, #tpu.memory_space<vmem>>, vector<1x4x128xf32>,
    %cst_48 = arith.constant 0.000000e+00 : f32
    %88 = vector.broadcast %cst_48 : f32 to vector<4x128xf32>
    %cst_49 = arith.constant 0.000000e+00 : f32
    %89 = vector.broadcast %cst_49 : f32 to vector<4x128xf32>
    %c0_50 = arith.constant 0 : index
    %c4_51 = arith.constant 4 : index
    %c0_52 = arith.constant 0 : index
    %90 = vector.load %arg1[%c0_50, %c4_51, %c0_52] : memref<2x8x128xf32, #tpu.memory_space<vmem>>, vector<1x1x128xf32>
    %91 = vector.shape_cast %90 : vector<1x1x128xf32> to vector<1x128xf32>
    %c1_53 = arith.constant 1 : index
    %c4_54 = arith.constant 4 : index
    %c0_55 = arith.constant 0 : index
    %92 = vector.load %arg1[%c1_53, %c4_54, %c0_55] : memref<2x8x128xf32, #tpu.memory_space<vmem>>, vector<1x1x128xf32>
    %93 = vector.shape_cast %92 : vector<1x1x128xf32> to vector<1x128xf32>
    %c0_56 = arith.constant 0 : index
    %c0_57 = arith.constant 0 : index
    %c0_58 = arith.constant 0 : index
    %94 = vector.load %arg2[%c0_56, %c0_57, %c0_58] : memref<2x16x128xf32, #tpu.memory_space<vmem>>, vector<1x4x128xf32>
    %95 = vector.shape_cast %94 : vector<1x4x128xf32> to vector<4x128xf32>
    %c1_59 = arith.constant 1 : index
    %c0_60 = arith.constant 0 : index
    %c0_61 = arith.constant 0 : index
    %96 = vector.load %arg2[%c1_59, %c0_60, %c0_61] : memref<2x16x128xf32, #tpu.memory_space<vmem>>, vector<1x4x128xf32>
    %97 = vector.shape_cast %96 : vector<1x4x128xf32> to vector<4x128xf32>
    %98 = vector.broadcast %91 : vector<1x128xf32> to vector<4x128xf32>
    %99 = arith.mulf %98, %95 : vector<4x128xf32>
    %100 = arith.addf %88, %99 : vector<4x128xf32>
    %101 = vector.broadcast %93 : vector<1x128xf32> to vector<4x128xf32>
    %102 = arith.mulf %101, %97 : vector<4x128xf32>
    %103 = arith.subf %100, %102 : vector<4x128xf32>
    %104 = vector.broadcast %91 : vector<1x128xf32> to vector<4x128xf32>
    %105 = arith.mulf %104, %97 : vector<4x128xf32>
    %106 = arith.addf %89, %105 : vector<4x128xf32>
    %107 = vector.broadcast %93 : vector<1x128xf32> to vector<4x128xf32>
    %108 = arith.mulf %107, %95 : vector<4x128xf32>
    %109 = arith.addf %106, %108 : vector<4x128xf32>
    %c0_62 = arith.constant 0 : index
    %c5 = arith.constant 5 : index
    %c0_63 = arith.constant 0 : index
    %110 = vector.load %arg1[%c0_62, %c5, %c0_63] : memref<2x8x128xf32, #tpu.memory_space<vmem>>, vector<1x1x128xf32>
    %111 = vector.shape_cast %110 : vector<1x1x128xf32> to vector<1x128xf32>
    %c1_64 = arith.constant 1 : index
    %c5_65 = arith.constant 5 : index
    %c0_66 = arith.constant 0 : index
    %112 = vector.load %arg1[%c1_64, %c5_65, %c0_66] : memref<2x8x128xf32, #tpu.memory_space<vmem>>, vector<1x1x128xf32>
    %113 = vector.shape_cast %112 : vector<1x1x128xf32> to vector<1x128xf32>
    %c0_67 = arith.constant 0 : index
    %c4_68 = arith.constant 4 : index
    %c0_69 = arith.constant 0 : index
    %114 = vector.load %arg2[%c0_67, %c4_68, %c0_69] : memref<2x16x128xf32, #tpu.memory_space<vmem>>, vector<1x4x128xf32>
    %115 = vector.shape_cast %114 : vector<1x4x128xf32> to vector<4x128xf32>
    %c1_70 = arith.constant 1 : index
    %c4_71 = arith.constant 4 : index
    %c0_72 = arith.constant 0 : index
    %116 = vector.load %arg2[%c1_70, %c4_71, %c0_72] : memref<2x16x128xf32, #tpu.memory_space<vmem>>, vector<1x4x128xf32>
    %117 = vector.shape_cast %116 : vector<1x4x128xf32> to vector<4x128xf32>
    %118 = vector.broadcast %111 : vector<1x128xf32> to vector<4x128xf32>
    %119 = arith.mulf %118, %115 : vector<4x128xf32>
    %120 = arith.addf %103, %119 : vector<4x128xf32>
    %121 = vector.broadcast %113 : vector<1x128xf32> to vector<4x128xf32>
    %122 = arith.mulf %121, %117 : vector<4x128xf32>
    %123 = arith.subf %120, %122 : vector<4x128xf32>
    %124 = vector.broadcast %111 : vector<1x128xf32> to vector<4x128xf32>
    %125 = arith.mulf %124, %117 : vector<4x128xf32>
    %126 = arith.addf %109, %125 : vector<4x128xf32>
    %127 = vector.broadcast %113 : vector<1x128xf32> to vector<4x128xf32>
    %128 = arith.mulf %127, %115 : vector<4x128xf32>
    %129 = arith.addf %126, %128 : vector<4x128xf32>
    %c0_73 = arith.constant 0 : index
    %c6 = arith.constant 6 : index
    %c0_74 = arith.constant 0 : index
    %130 = vector.load %arg1[%c0_73, %c6, %c0_74] : memref<2x8x128xf32, #tpu.memory_space<vmem>>, vector<1x1x128xf32>
    %131 = vector.shape_cast %130 : vector<1x1x128xf32> to vector<1x128xf32>
    %c1_75 = arith.constant 1 : index
    %c6_76 = arith.constant 6 : index
    %c0_77 = arith.constant 0 : index
    %132 = vector.load %arg1[%c1_75, %c6_76, %c0_77] : memref<2x8x128xf32, #tpu.memory_space<vmem>>, vector<1x1x128xf32>
    %133 = vector.shape_cast %132 : vector<1x1x128xf32> to vector<1x128xf32>
    %c0_78 = arith.constant 0 : index
    %c8_79 = arith.constant 8 : index
    %c0_80 = arith.constant 0 : index
    %134 = vector.load %arg2[%c0_78, %c8_79, %c0_80] : memref<2x16x128xf32, #tpu.memory_space<vmem>>, vector<1x4x128xf32>
    %135 = vector.shape_cast %134 : vector<1x4x128xf32> to vector<4x128xf32>
    %c1_81 = arith.constant 1 : index
    %c8_82 = arith.constant 8 : index
    %c0_83 = arith.constant 0 : index
    %136 = vector.load %arg2[%c1_81, %c8_82, %c0_83] : memref<2x16x128xf32, #tpu.memory_space<vmem>>, vector<1x4x128xf32>
    %137 = vector.shape_cast %136 : vector<1x4x128xf32> to vector<4x128xf32>
    %138 = vector.broadcast %131 : vector<1x128xf32> to vector<4x128xf32>
    %139 = arith.mulf %138, %135 : vector<4x128xf32>
    %140 = arith.addf %123, %139 : vector<4x128xf32>
    %141 = vector.broadcast %133 : vector<1x128xf32> to vector<4x128xf32>
    %142 = arith.mulf %141, %137 : vector<4x128xf32>
    %143 = arith.subf %140, %142 : vector<4x128xf32>
    %144 = vector.broadcast %131 : vector<1x128xf32> to vector<4x128xf32>
    %145 = arith.mulf %144, %137 : vector<4x128xf32>
    %146 = arith.addf %129, %145 : vector<4x128xf32>
    %147 = vector.broadcast %133 : vector<1x128xf32> to vector<4x128xf32>
    %148 = arith.mulf %147, %135 : vector<4x128xf32>
    %149 = arith.addf %146, %148 : vector<4x128xf32>
    %c0_84 = arith.constant 0 : index
    %c7 = arith.constant 7 : index
    %c0_85 = arith.constant 0 : index
    %150 = vector.load %arg1[%c0_84, %c7, %c0_85] : memref<2x8x128xf32, #tpu.memory_space<vmem>>, vector<1x1x128xf32>
    %151 = vector.shape_cast %150 : vector<1x1x128xf32> to vector<1x128xf32>
    %c1_86 = arith.constant 1 : index
    %c7_87 = arith.constant 7 : index
    %c0_88 = arith.constant 0 : index
    %152 = vector.load %arg1[%c1_86, %c7_87, %c0_88] : memref<2x8x128xf32, #tpu.memory_space<vmem>>, vector<1x1x128xf32>
    %153 = vector.shape_cast %152 : vector<1x1x128xf32> to vector<1x128xf32>
    %c0_89 = arith.constant 0 : index
    %c12_90 = arith.constant 12 : index
    %c0_91 = arith.constant 0 : index
    %154 = vector.load %arg2[%c0_89, %c12_90, %c0_91] : memref<2x16x128xf32, #tpu.memory_space<vmem>>, vector<1x4x128xf32>
    %155 = vector.shape_cast %154 : vector<1x4x128xf32> to vector<4x128xf32>
    %c1_92 = arith.constant 1 : index
    %c12_93 = arith.constant 12 : index
    %c0_94 = arith.constant 0 : index
    %156 = vector.load %arg2[%c1_92, %c12_93, %c0_94] : memref<2x16x128xf32, #tpu.memory_space<vmem>>, vector<1x4x128xf32>
    %157 = vector.shape_cast %156 : vector<1x4x128xf32> to vector<4x128xf32>
    %158 = vector.broadcast %151 : vector<1x128xf32> to vector<4x128xf32>
    %159 = arith.mulf %158, %155 : vector<4x128xf32>
    %160 = arith.addf %143, %159 : vector<4x128xf32>
    %161 = vector.broadcast %153 : vector<1x128xf32> to vector<4x128xf32>
    %162 = arith.mulf %161, %157 : vector<4x128xf32>
    %163 = arith.subf %160, %162 : vector<4x128xf32>
    %164 = vector.broadcast %151 : vector<1x128xf32> to vector<4x128xf32>
    %165 = arith.mulf %164, %157 : vector<4x128xf32>
    %166 = arith.addf %149, %165 : vector<4x128xf32>
    %167 = vector.broadcast %153 : vector<1x128xf32> to vector<4x128xf32>
    %168 = arith.mulf %167, %155 : vector<4x128xf32>
    %169 = arith.addf %166, %168 : vector<4x128xf32>
    %c0_95 = arith.constant 0 : index
    %c4_96 = arith.constant 4 : index
    %c0_97 = arith.constant 0 : index
    %170 = vector.load %arg3[%c0_95, %c4_96, %c0_97] : memref<2x8x128xf32, #tpu.memory_space<vmem>>, vector<1x4x128xf32>
    %171 = vector.shape_cast %170 : vector<1x4x128xf32> to vector<4x128xf32>
    %172 = vector.shape_cast %163 : vector<4x128xf32> to vector<1x4x128xf32>
    tpu.vector_store %arg3[%c0_95, %c4_96, %c0_97], %172 {strides = array<i32>} : memref<2x8x128xf32, #tpu.memory_space<vmem>>, vector<1x4x128xf32>,
    %c1_98 = arith.constant 1 : index
    %c4_99 = arith.constant 4 : index
    %c0_100 = arith.constant 0 : index
    %173 = vector.load %arg3[%c1_98, %c4_99, %c0_100] : memref<2x8x128xf32, #tpu.memory_space<vmem>>, vector<1x4x128xf32>
    %174 = vector.shape_cast %173 : vector<1x4x128xf32> to vector<4x128xf32>
    %175 = vector.shape_cast %169 : vector<4x128xf32> to vector<1x4x128xf32>
    tpu.vector_store %arg3[%c1_98, %c4_99, %c0_100], %175 {strides = array<i32>} : memref<2x8x128xf32, #tpu.memory_space<vmem>>, vector<1x4x128xf32>,
    return
  }
  func.func @transform_0(%arg0: i32) -> (i32, i32, i32) {
    %c0_i32 = arith.constant 0 : i32
    %c0_i32_0 = arith.constant 0 : i32
    %c0_i32_1 = arith.constant 0 : i32
    return %c0_i32, %c0_i32_0, %arg0 : i32, i32, i32
  }
  func.func @transform_1(%arg0: i32) -> (i32, i32, i32) {
    %c0_i32 = arith.constant 0 : i32
    %c0_i32_0 = arith.constant 0 : i32
    %c0_i32_1 = arith.constant 0 : i32
    return %c0_i32, %c0_i32_0, %arg0 : i32, i32, i32
  }
  func.func @transform_2(%arg0: i32) -> (i32, i32, i32) {
    %c0_i32 = arith.constant 0 : i32
    %c0_i32_0 = arith.constant 0 : i32
    %c0_i32_1 = arith.constant 0 : i32
    return %c0_i32, %c0_i32_0, %arg0 : i32, i32, i32
  }
}

</mosaic_0001>

<bundles_post_ra>
// kernel: tpu_custom_call.1
= control target key start
LH: loop header
LB: loop body
LE: loop exit
PB: predicated region body
PF: predicated region fallthrough
CT: control target
= control target key end

     0   :  { %7 = vsyncpa [#allocation3], 0  ;;  %s383_s0 = inlined_call_operand.hbm [shape: f32[2,8,128], index: 0, kind: input, shape index: {}]   ;;  %s384_s1 = inlined_call_operand.hbm [shape: f32[2,16,128], index: 1, kind: input, shape index: {}]   ;;  %s385_s2 = inlined_call_operand.hbm [shape: f32[2,8,128], index: 2, kind: output, shape index: {}]  }
   0x1   :  { %8 = vsyncpa [#allocation6], 0 }
   0x2   :  { %9 = vsyncpa [#allocation4], 0  ;;  %s318_s9 = smov [#allocation2]   ;;  %s246_s13 = scalar_lea.hbm %s383_s0, 256 }
   0x3   :  { %s15_s10 = sshll.u32 %s318_s9, 4  ;;  %p247_p0 = scmp.ne.s32.totalorder %s383_s0, %s246_s13  ;;  %s16_s10 = int_to_ptr.vmem [resolvable:$true] %s15_s10 }
   0x4   :  { %p250_p1 = scmp.lt.u32.totalorder %s246_s13, %s383_s0 }
   0x6   :  { %p252_p2 = pnand %p250_p1, %p247_p0 }
   0x8   :  { %255 = shalt.err (!%p252_p2)
}
   0x9   :  { %s256_s18 = scalar_lea.vmem %s16_s10, 256  ;;  %p261_p4 = scmp.lt.s32.totalorder %s16_s10, %s16_s10 }
   0xa   :  { %p257_p3 = scmp.ne.s32.totalorder %s16_s10, %s256_s18  ;;  %p262_p5 = scmp.lt.s32.totalorder %s256_s18, %s256_s18 }
   0xc   :  { %p263_p6 = por %p262_p5, %p261_p4 }
   0xe   :  { %p264_p7 = pnand %p263_p6, %p257_p3 }
  0x10   :  { %267 = shalt.err (!%p264_p7)
}
  0x11   :  { %s319_s19 = smov 128   ;;  %s320_s20 = smov 8  }
  0x12   :  { %21 = dma.hbm_to_vmem [thread:$0]  %s383_s0, 256, %s16_s10, [#allocation3], %s319_s19, %s319_s19, %s320_s20  }
  0x13   :  { %s321_s23 = smov [#allocation5]   ;;  %s268_s27 = scalar_lea.hbm %s384_s1, 512 }
  0x14   :  { %s27_s24 = sshll.u32 %s321_s23, 4  ;;  %p269_p8 = scmp.ne.s32.totalorder %s384_s1, %s268_s27  ;;  %s28_s24 = int_to_ptr.vmem [resolvable:$true] %s27_s24 }
  0x15   :  { %p272_p9 = scmp.lt.u32.totalorder %s268_s27, %s384_s1 }
  0x17   :  { %p274_p10 = pnand %p272_p9, %p269_p8 }
  0x19   :  { %277 = shalt.err (!%p274_p10)
}
  0x1a   :  { %s278_s4 = scalar_lea.vmem %s28_s24, 512  ;;  %p283_p12 = scmp.lt.s32.totalorder %s28_s24, %s28_s24 }
  0x1b   :  { %p279_p11 = scmp.ne.s32.totalorder %s28_s24, %s278_s4  ;;  %p284_p13 = scmp.lt.s32.totalorder %s278_s4, %s278_s4 }
  0x1d   :  { %p285_p0 = por %p284_p13, %p283_p12 }
  0x1f   :  { %p286_p1 = pnand %p285_p0, %p279_p11 }
  0x21   :  { %289 = shalt.err (!%p286_p1)
}
  0x22   :  { %33 = dma.hbm_to_vmem [thread:$0]  %s384_s1, 512, %s28_s24, [#allocation6], %s319_s19, %s319_s19, %s320_s20  }
  0x23   :  { %312 = dma.done.wait [#allocation3], 256  }
  0x24   :  { %313 = vsyncadd [#allocation3], 4294967040 }
  0x25   :  { %314 = dma.done.wait [#allocation6], 512  }
  0x26   :  { %315 = vsyncadd [#allocation6], 4294966784  ;;  %v225_v0 = vld [vmem:[#allocation2] ss:$0 sm:$0xff]  ;;  %v226_v1 = vld [vmem:[#allocation2 + $0x8] ss:$0 sm:$0xff] }
  0x27   :  { %v43_v2 = vld [vmem:[#allocation5] sm:$0xf]  ;;  %v45_v3 = vld [vmem:[#allocation5 + $0x10] sm:$0xf]  ;;  %v228_v6 = vld [vmem:[#allocation2 + $0x9] ss:$0 sm:$0xff] }
  0x28   :  { %v50_v4 = vmul.f32 %v225_v0, %v43_v2  ;;  %v227_v5 = vld [vmem:[#allocation2 + $0x1] ss:$0 sm:$0xff]  ;;  %v60_v7 = vmul.f32 %v226_v1, %v43_v2  ;;  %v56_v8 = vmul.f32 %v226_v1, %v45_v3  ;;  %v64_v9 = vld [vmem:[#allocation5 + $0x4] sm:$0xf]  ;;  %v65_v10 = vld [vmem:[#allocation5 + $0x14] sm:$0xf]  ;;  %v58_v12 = vmul.f32 %v225_v0, %v45_v3 }
  0x29   :  { %v229_v11 = vld [vmem:[#allocation2 + $0x2] ss:$0 sm:$0xff]  ;;  %v70_v13 = vmul.f32 %v227_v5, %v64_v9  ;;  %v230_v14 = vld [vmem:[#allocation2 + $0xa] ss:$0 sm:$0xff]  ;;  %v84_v15 = vld [vmem:[#allocation5 + $0x8] sm:$0xf]  ;;  %v78_v17 = vmul.f32 %v227_v5, %v65_v10  ;;  %v76_v19 = vmul.f32 %v228_v6, %v65_v10  ;;  %v80_v23 = vmul.f32 %v228_v6, %v64_v9 }
  0x2a   :  { %v85_v16 = vld [vmem:[#allocation5 + $0x18] sm:$0xf]  ;;  %v57_v18 = vsub.f32 %v50_v4, %v56_v8  ;;  %v231_v20 = vld [vmem:[#allocation2 + $0x3] ss:$0 sm:$0xff]  ;;  %v104_v21 = vld [vmem:[#allocation5 + $0xc] sm:$0xf]  ;;  %v61_v22 = vadd.f32 %v60_v7, %v58_v12  ;;  %v90_v24 = vmul.f32 %v229_v11, %v84_v15  ;;  %v100_v46 = vmul.f32 %v230_v14, %v84_v15 }
  0x2b   :  { %v96_v25 = vmul.f32 %v230_v14, %v85_v16  ;;  %v105_v26 = vld [vmem:[#allocation5 + $0x1c] sm:$0xf]  ;;  %v233_v27 = vld [vmem:[#allocation2 + $0x4] ss:$0 sm:$0xff]  ;;  %v110_v30 = vmul.f32 %v231_v20, %v104_v21  ;;  %v98_v32 = vmul.f32 %v229_v11, %v85_v16  ;;  %v127_v33 = vld [vmem:[#allocation5] sm:$0xf] }
  0x2c   :  { %v234_v28 = vld [vmem:[#allocation2 + $0xc] ss:$0 sm:$0xff]  ;;  %v71_v29 = vadd.f32 %v70_v13, %v57_v18  ;;  %v79_v31 = vadd.f32 %v78_v17, %v61_v22  ;;  %v128_v34 = vld [vmem:[#allocation5 + $0x10] sm:$0xf]  ;;  %v235_v35 = vld [vmem:[#allocation2 + $0x5] ss:$0 sm:$0xff]  ;;  %v133_v36 = vmul.f32 %v233_v27, %v127_v33  ;;  %v118_v57 = vmul.f32 %v231_v20, %v105_v26 }
  0x2d   :  { %v139_v37 = vmul.f32 %v234_v28, %v128_v34  ;;  %v236_v38 = vld [vmem:[#allocation2 + $0xd] ss:$0 sm:$0xff]  ;;  %v147_v39 = vld [vmem:[#allocation5 + $0x4] sm:$0xf]  ;;  %v148_v40 = vld [vmem:[#allocation5 + $0x14] sm:$0xf]  ;;  %v141_v41 = vmul.f32 %v233_v27, %v128_v34  ;;  %v143_v42 = vmul.f32 %v234_v28, %v127_v33 }
  0x2e   :  { %v77_v43 = vsub.f32 %v71_v29, %v76_v19  ;;  %v232_v44 = vld [vmem:[#allocation2 + $0xb] ss:$0 sm:$0xff]  ;;  %v81_v45 = vadd.f32 %v80_v23, %v79_v31  ;;  %v153_v47 = vmul.f32 %v235_v35, %v147_v39  ;;  %v237_v48 = vld [vmem:[#allocation2 + $0x6] ss:$0 sm:$0xff]  ;;  %v167_v49 = vld [vmem:[#allocation5 + $0x8] sm:$0xf]  ;;  %v159_v51 = vmul.f32 %v236_v38, %v148_v40 }
  0x2f   :  { %v140_v50 = vsub.f32 %v133_v36, %v139_v37  ;;  %v168_v52 = vld [vmem:[#allocation5 + $0x18] sm:$0xf]  ;;  %v144_v53 = vadd.f32 %v143_v42, %v141_v41  ;;  %v161_v54 = vmul.f32 %v235_v35, %v148_v40  ;;  %v238_v58 = vld [vmem:[#allocation2 + $0xe] ss:$0 sm:$0xff]  ;;  %v163_v59 = vmul.f32 %v236_v38, %v147_v39  ;;  %v239_v3 = vld [vmem:[#allocation2 + $0x7] ss:$0 sm:$0xff] }
  0x30   :  { %v91_v55 = vadd.f32 %v90_v24, %v77_v43  ;;  %v99_v56 = vadd.f32 %v98_v32, %v81_v45  ;;  %v120_v60 = vmul.f32 %v232_v44, %v104_v21  ;;  %v173_v62 = vmul.f32 %v237_v48, %v167_v49  ;;  %v187_v4 = vld [vmem:[#allocation5 + $0xc] sm:$0xf]  ;;  %v188_v5 = vld [vmem:[#allocation5 + $0x1c] sm:$0xf]  ;;  %s322_s1 = smov [#allocation7]  }
  0x31   :  { %v154_v61 = vadd.f32 %v153_v47, %v140_v50  ;;  %v162_v63 = vadd.f32 %v161_v54, %v144_v53  ;;  %v116_v1 = vmul.f32 %v232_v44, %v105_v26  ;;  %v181_v6 = vmul.f32 %v237_v48, %v168_v52  ;;  %v240_v13 = vld [vmem:[#allocation2 + $0xf] ss:$0 sm:$0xff]  ;;  %s212_s6 = sshll.u32 %s322_s1, 4  ;;  %s213_s6 = int_to_ptr.vmem [resolvable:$true] %s212_s6 }
  0x32   :  { %v97_v0 = vsub.f32 %v91_v55, %v96_v25  ;;  %v101_v2 = vadd.f32 %v100_v46, %v99_v56  ;;  %v179_v8 = vmul.f32 %v238_v58, %v168_v52  ;;  %v183_v10 = vmul.f32 %v238_v58, %v167_v49  ;;  %s290_s7 = scalar_lea.vmem %s213_s6, 256  ;;  %p295_p3 = scmp.lt.s32.totalorder %s213_s6, %s213_s6 }
  0x33   :  { %v160_v7 = vsub.f32 %v154_v61, %v159_v51  ;;  %v164_v9 = vadd.f32 %v163_v59, %v162_v63  ;;  %v193_v15 = vmul.f32 %v239_v3, %v187_v4  ;;  %v201_v17 = vmul.f32 %v239_v3, %v188_v5  ;;  %p291_p2 = scmp.ne.s32.totalorder %s213_s6, %s290_s7  ;;  %p296_p4 = scmp.lt.s32.totalorder %s290_s7, %s290_s7 }
  0x34   :  { %v111_v11 = vadd.f32 %v110_v30, %v97_v0  ;;  %v119_v12 = vadd.f32 %v118_v57, %v101_v2  ;;  %v199_v21 = vmul.f32 %v240_v13, %v188_v5  ;;  %v203_v23 = vmul.f32 %v240_v13, %v187_v4 }
  0x35   :  { %v174_v14 = vadd.f32 %v173_v62, %v160_v7  ;;  %v182_v16 = vadd.f32 %v181_v6, %v164_v9  ;;  %p297_p5 = por %p296_p4, %p295_p3 }
  0x36   :  { %v117_v18 = vsub.f32 %v111_v11, %v116_v1  ;;  %v121_v19 = vadd.f32 %v120_v60, %v119_v12 }
  0x37   :  { %v180_v20 = vsub.f32 %v174_v14, %v179_v8  ;;  %v184_v22 = vadd.f32 %v183_v10, %v182_v16  ;;  %p298_p6 = pnand %p297_p5, %p291_p2 }
  0x38   :  { %122 = vst [vmem:[#allocation7] sm:$0xf] %v117_v18  ;;  %124 = vst [vmem:[#allocation7 + $0x8] sm:$0xf] %v121_v19 }
  0x39   :  { %v194_v24 = vadd.f32 %v193_v15, %v180_v20  ;;  %v202_v25 = vadd.f32 %v201_v17, %v184_v22 }
  0x3b   :  { %v200_v26 = vsub.f32 %v194_v24, %v199_v21  ;;  %v204_v27 = vadd.f32 %v203_v23, %v202_v25 }
  0x3d   :  { %205 = vst [vmem:[#allocation7 + $0x4] sm:$0xf] %v200_v26  ;;  %206 = vst [vmem:[#allocation7 + $0xc] sm:$0xf] %v204_v27 }
  0x3e   :  { %301 = shalt.err (!%p298_p6)
}
  0x3f   :  { %s302_s10 = scalar_lea.hbm %s385_s2, 256 }
  0x40   :  { %p303_p7 = scmp.ne.s32.totalorder %s385_s2, %s302_s10  ;;  %p306_p8 = scmp.lt.u32.totalorder %s302_s10, %s385_s2 }
  0x42   :  { %p308_p9 = pnand %p306_p8, %p303_p7 }
  0x44   :  { %311 = shalt.err (!%p308_p9)
}
  0x45   :  { %218 = dma.vmem_to_hbm [thread:$0]  %s213_s6, 256, %s385_s2, [#allocation4], %s319_s19, %s319_s19, %s320_s20  }
  0x46   :  { %316 = dma.done.wait [#allocation4], 256  }
  0x47   :  { %317 = vsyncadd [#allocation4], 4294967040 }
  0x48   :  { %222 = vsyncpa [#allocation3], 1 }
  0x49   :  { %223 = vsyncpa [#allocation6], 1 }
  0x4a   :  { %224 = vsyncpa [#allocation4], 1 }

</bundles_post_ra>
